<compile_context>
chip_gen: v7x
topology: tpu7x:2x2x1
jax: 0.10.0
libtpu: 0.0.40
codegen_flags: <defaults>
</compile_context>

<pallas_src>
import jax
import jax.numpy as jnp
from jax.experimental import pallas as pl
from jax.experimental.pallas import tpu as pltpu


def mlp_kernel(x_ref, w1_ref, b1_ref, w2_ref, b2_ref, w3_ref, b3_ref, o_ref):
    x = x_ref[...]                         # (4, TB)  batch on the 128-lane axis
    w1 = w1_ref[...]                       # (64, 4)

    # Layer 1, K=4: VPU broadcast multiply-adds (outer products), not the MXU.
    h1 = (w1[:, 0:1] * x[0:1, :]
          + w1[:, 1:2] * x[1:2, :]
          + w1[:, 2:3] * x[2:3, :]
          + w1[:, 3:4] * x[3:4, :]
          + b1_ref[...])                   # (64, TB)
    h1 = jnp.maximum(h1, 0.0)

    # Layer 2: (64,64) @ (64,TB) on the MXU, lane-dense N = TB.
    h2 = jnp.dot(w2_ref[...], h1, preferred_element_type=jnp.float32) + b2_ref[...]
    h2 = jnp.maximum(h2, 0.0)

    # Layer 3: (2,64) @ (64,TB) -> lane-dense (2, TB) output block.
    out = jnp.dot(w3_ref[...], h2, preferred_element_type=jnp.float32) + b3_ref[...]
    o_ref[...] = out.astype(o_ref.dtype)


def custom_mlp(x, params, *, tile_b=None):
    """x: (B, 4) float32. params: w1 (64,4), b1 (64,1), w2 (64,64), b2 (64,1),
    w3 (2,64), b3 (2,1)  (PyTorch nn.Linear (out,in) layout)."""
    B, F = x.shape
    assert F == 4
    if tile_b is None:
        # 512-row tiles by default (sweepable 512-2048); clamp for tiny batches
        # so padding stays cheap. Must be a multiple of 128 lanes.
        tile_b = min(512, ((B + 127) // 128) * 128)
    assert tile_b % 128 == 0, "tile_b must be a multiple of 128 (lane width)"

    n_tiles = pl.cdiv(B, tile_b)
    Bp = n_tiles * tile_b

    # Layout plumbing in the wrapper: feature-major x, zero-pad batch to tile.
    xt = jnp.transpose(x)                                  # (4, B)
    if Bp != B:
        xt = jnp.pad(xt, ((0, 0), (0, Bp - B)))            # (4, Bp)

    w1, b1, w2, b2, w3, b3 = (params[k] for k in ("w1", "b1", "w2", "b2", "w3", "b3"))
    resident = lambda a: pl.BlockSpec(a.shape, lambda i: (0, 0))  # constant index_map

    out_t = pl.pallas_call(
        mlp_kernel,
        out_shape=jax.ShapeDtypeStruct((2, Bp), x.dtype),
        grid_spec=pltpu.PrefetchScalarGridSpec(
            num_scalar_prefetch=0,
            grid=(n_tiles,),
            in_specs=[
                pl.BlockSpec((4, tile_b), lambda i: (0, i)),   # x tile, batch on lanes
                resident(w1), resident(b1),
                resident(w2), resident(b2),
                resident(w3), resident(b3),
            ],
            out_specs=pl.BlockSpec((2, tile_b), lambda i: (0, i)),
        ),
        compiler_params=pltpu.CompilerParams(
            dimension_semantics=("parallel",),   # shards across TCs on v7x
        ),
    )(xt, w1, b1, w2, b2, w3, b3)

    return jnp.transpose(out_t)[:B]                         # (B, 2)


def init_params(key):
    """Deterministic init mimicking nn.Linear default (uniform +-1/sqrt(fan_in)).
    Weights stored (out, in), biases (out, 1) to match the feature-major kernel."""
    def linear(k, fan_in, fan_out):
        kw, kb = jax.random.split(k)
        bound = 1.0 / jnp.sqrt(fan_in)
        w = jax.random.uniform(kw, (fan_out, fan_in), jnp.float32, -bound, bound)
        b = jax.random.uniform(kb, (fan_out, 1), jnp.float32, -bound, bound)
        return w, b

    k1, k2, k3 = jax.random.split(key, 3)
    w1, b1 = linear(k1, 4, 64)
    w2, b2 = linear(k2, 64, 64)
    w3, b3 = linear(k3, 64, 2)
    return dict(w1=w1, b1=b1, w2=w2, b2=b2, w3=w3, b3=b3)


def reference_mlp(x, p):
    h = jnp.maximum(x @ p["w1"].T + p["b1"].T, 0.0)
    h = jnp.maximum(h @ p["w2"].T + p["b2"].T, 0.0)
    return h @ p["w3"].T + p["b3"].T


if __name__ == "__main__":
    key = jax.random.PRNGKey(0)
    kp, kx = jax.random.split(key)
    params = init_params(kp)
    x = jax.random.normal(kx, (8, 4), jnp.float32)   # batch=8, in_features=4

    out = custom_mlp(x, params)
    out = jax.block_until_ready(out)

    ref = reference_mlp(x, params)
    assert out.shape == (8, 2)
    assert jnp.allclose(out, ref, atol=1e-5, rtol=1e-5)
    print("KERNEL_OK")
</pallas_src>

<mosaic_0001>
module attributes {stable_mosaic.version = 11 : i64} {
  func.func @mlp_kernel(%arg0: i32, %arg1: memref<4x128xf32, #tpu.memory_space<vmem>>, %arg2: memref<64x4xf32, #tpu.memory_space<vmem>>, %arg3: memref<64x1xf32, #tpu.memory_space<vmem>>, %arg4: memref<64x64xf32, #tpu.memory_space<vmem>>, %arg5: memref<64x1xf32, #tpu.memory_space<vmem>>, %arg6: memref<2x64xf32, #tpu.memory_space<vmem>>, %arg7: memref<2x1xf32, #tpu.memory_space<vmem>>, %arg8: memref<2x128xf32, #tpu.memory_space<vmem>>) attributes {dimension_semantics = [#tpu.dimension_semantics<parallel>], iteration_bounds = array<i64: 1>, scalar_prefetch = 0 : i64, scratch_operands = 0 : i64, tpu.core_type = #tpu.core_type<tc>, window_params = [{transform_indices = @transform_0, window_bounds = array<i64: 4, 128>}, {pipeline_mode = #tpu.pipeline_mode<synchronous>, transform_indices = @transform_1, window_bounds = array<i64: 64, 4>}, {pipeline_mode = #tpu.pipeline_mode<synchronous>, transform_indices = @transform_2, window_bounds = array<i64: 64, 1>}, {pipeline_mode = #tpu.pipeline_mode<synchronous>, transform_indices = @transform_3, window_bounds = array<i64: 64, 64>}, {pipeline_mode = #tpu.pipeline_mode<synchronous>, transform_indices = @transform_4, window_bounds = array<i64: 64, 1>}, {pipeline_mode = #tpu.pipeline_mode<synchronous>, transform_indices = @transform_5, window_bounds = array<i64: 2, 64>}, {pipeline_mode = #tpu.pipeline_mode<synchronous>, transform_indices = @transform_6, window_bounds = array<i64: 2, 1>}, {transform_indices = @transform_7, window_bounds = array<i64: 2, 128>}]} {
    %c0 = arith.constant 0 : index
    %c0_0 = arith.constant 0 : index
    %0 = vector.load %arg1[%c0, %c0_0] : memref<4x128xf32, #tpu.memory_space<vmem>>, vector<4x128xf32>
    %c0_1 = arith.constant 0 : index
    %c0_2 = arith.constant 0 : index
    %1 = vector.load %arg2[%c0_1, %c0_2] : memref<64x4xf32, #tpu.memory_space<vmem>>, vector<64x4xf32>
    %2 = vector.extract_strided_slice %1 {offsets = [0, 0], sizes = [64, 1], strides = [1, 1]} : vector<64x4xf32> to vector<64x1xf32>
    %3 = vector.extract_strided_slice %0 {offsets = [0, 0], sizes = [1, 128], strides = [1, 1]} : vector<4x128xf32> to vector<1x128xf32>
    %4 = vector.broadcast %2 : vector<64x1xf32> to vector<64x128xf32>
    %5 = vector.broadcast %3 : vector<1x128xf32> to vector<64x128xf32>
    %6 = arith.mulf %4, %5 : vector<64x128xf32>
    %7 = vector.extract_strided_slice %1 {offsets = [0, 1], sizes = [64, 1], strides = [1, 1]} : vector<64x4xf32> to vector<64x1xf32>
    %8 = vector.extract_strided_slice %0 {offsets = [1, 0], sizes = [1, 128], strides = [1, 1]} : vector<4x128xf32> to vector<1x128xf32>
    %9 = vector.broadcast %7 : vector<64x1xf32> to vector<64x128xf32>
    %10 = vector.broadcast %8 : vector<1x128xf32> to vector<64x128xf32>
    %11 = arith.mulf %9, %10 : vector<64x128xf32>
    %12 = arith.addf %6, %11 : vector<64x128xf32>
    %13 = vector.extract_strided_slice %1 {offsets = [0, 2], sizes = [64, 1], strides = [1, 1]} : vector<64x4xf32> to vector<64x1xf32>
    %14 = vector.extract_strided_slice %0 {offsets = [2, 0], sizes = [1, 128], strides = [1, 1]} : vector<4x128xf32> to vector<1x128xf32>
    %15 = vector.broadcast %13 : vector<64x1xf32> to vector<64x128xf32>
    %16 = vector.broadcast %14 : vector<1x128xf32> to vector<64x128xf32>
    %17 = arith.mulf %15, %16 : vector<64x128xf32>
    %18 = arith.addf %12, %17 : vector<64x128xf32>
    %19 = vector.extract_strided_slice %1 {offsets = [0, 3], sizes = [64, 1], strides = [1, 1]} : vector<64x4xf32> to vector<64x1xf32>
    %20 = vector.extract_strided_slice %0 {offsets = [3, 0], sizes = [1, 128], strides = [1, 1]} : vector<4x128xf32> to vector<1x128xf32>
    %21 = vector.broadcast %19 : vector<64x1xf32> to vector<64x128xf32>
    %22 = vector.broadcast %20 : vector<1x128xf32> to vector<64x128xf32>
    %23 = arith.mulf %21, %22 : vector<64x128xf32>
    %24 = arith.addf %18, %23 : vector<64x128xf32>
    %c0_3 = arith.constant 0 : index
    %c0_4 = arith.constant 0 : index
    %25 = vector.load %arg3[%c0_3, %c0_4] : memref<64x1xf32, #tpu.memory_space<vmem>>, vector<64x1xf32>
    %26 = vector.broadcast %25 : vector<64x1xf32> to vector<64x128xf32>
    %27 = arith.addf %24, %26 : vector<64x128xf32>
    %cst = arith.constant 0.000000e+00 : f32
    %28 = vector.broadcast %cst : f32 to vector<64x128xf32>
    %29 = arith.maximumf %27, %28 : vector<64x128xf32>
    %c0_5 = arith.constant 0 : index
    %c0_6 = arith.constant 0 : index
    %30 = vector.load %arg4[%c0_5, %c0_6] : memref<64x64xf32, #tpu.memory_space<vmem>>, vector<64x64xf32>
    %cst_7 = arith.constant dense<0.000000e+00> : vector<64x128xf32>
    %31 = tpu.matmul %30, %29, %cst_7 {dimension_numbers = #tpu.dot_dimension_numbers<[1], [0], [0], [1], [0, 0, 1, 1], [], []>} : vector<64x64xf32>, vector<64x128xf32>, vector<64x128xf32> -> vector<64x128xf32>
    %c0_8 = arith.constant 0 : index
    %c0_9 = arith.constant 0 : index
    %32 = vector.load %arg5[%c0_8, %c0_9] : memref<64x1xf32, #tpu.memory_space<vmem>>, vector<64x1xf32>
    %33 = vector.broadcast %32 : vector<64x1xf32> to vector<64x128xf32>
    %34 = arith.addf %31, %33 : vector<64x128xf32>
    %cst_10 = arith.constant 0.000000e+00 : f32
    %35 = vector.broadcast %cst_10 : f32 to vector<64x128xf32>
    %36 = arith.maximumf %34, %35 : vector<64x128xf32>
    %c0_11 = arith.constant 0 : index
    %c0_12 = arith.constant 0 : index
    %37 = vector.load %arg6[%c0_11, %c0_12] : memref<2x64xf32, #tpu.memory_space<vmem>>, vector<2x64xf32>
    %cst_13 = arith.constant dense<0.000000e+00> : vector<2x128xf32>
    %38 = tpu.matmul %37, %36, %cst_13 {dimension_numbers = #tpu.dot_dimension_numbers<[1], [0], [0], [1], [0, 0, 1, 1], [], []>} : vector<2x64xf32>, vector<64x128xf32>, vector<2x128xf32> -> vector<2x128xf32>
    %c0_14 = arith.constant 0 : index
    %c0_15 = arith.constant 0 : index
    %39 = vector.load %arg7[%c0_14, %c0_15] : memref<2x1xf32, #tpu.memory_space<vmem>>, vector<2x1xf32>
    %40 = vector.broadcast %39 : vector<2x1xf32> to vector<2x128xf32>
    %41 = arith.addf %38, %40 : vector<2x128xf32>
    %c0_16 = arith.constant 0 : index
    %c0_17 = arith.constant 0 : index
    %42 = vector.load %arg8[%c0_16, %c0_17] : memref<2x128xf32, #tpu.memory_space<vmem>>, vector<2x128xf32>
    tpu.vector_store %arg8[%c0_16, %c0_17], %41 {strides = array<i32>} : memref<2x128xf32, #tpu.memory_space<vmem>>, vector<2x128xf32>,
    return
  }
  func.func @transform_0(%arg0: i32) -> (i32, i32) {
    %c0_i32 = arith.constant 0 : i32
    %c0_i32_0 = arith.constant 0 : i32
    return %c0_i32, %arg0 : i32, i32
  }
  func.func @transform_1(%arg0: i32) -> (i32, i32) {
    %c0_i32 = arith.constant 0 : i32
    %c0_i32_0 = arith.constant 0 : i32
    %c0_i32_1 = arith.constant 0 : i32
    return %c0_i32, %c0_i32_0 : i32, i32
  }
  func.func @transform_2(%arg0: i32) -> (i32, i32) {
    %c0_i32 = arith.constant 0 : i32
    %c0_i32_0 = arith.constant 0 : i32
    %c0_i32_1 = arith.constant 0 : i32
    return %c0_i32, %c0_i32_0 : i32, i32
  }
  func.func @transform_3(%arg0: i32) -> (i32, i32) {
    %c0_i32 = arith.constant 0 : i32
    %c0_i32_0 = arith.constant 0 : i32
    %c0_i32_1 = arith.constant 0 : i32
    return %c0_i32, %c0_i32_0 : i32, i32
  }
  func.func @transform_4(%arg0: i32) -> (i32, i32) {
    %c0_i32 = arith.constant 0 : i32
    %c0_i32_0 = arith.constant 0 : i32
    %c0_i32_1 = arith.constant 0 : i32
    return %c0_i32, %c0_i32_0 : i32, i32
  }
  func.func @transform_5(%arg0: i32) -> (i32, i32) {
    %c0_i32 = arith.constant 0 : i32
    %c0_i32_0 = arith.constant 0 : i32
    %c0_i32_1 = arith.constant 0 : i32
    return %c0_i32, %c0_i32_0 : i32, i32
  }
  func.func @transform_6(%arg0: i32) -> (i32, i32) {
    %c0_i32 = arith.constant 0 : i32
    %c0_i32_0 = arith.constant 0 : i32
    %c0_i32_1 = arith.constant 0 : i32
    return %c0_i32, %c0_i32_0 : i32, i32
  }
  func.func @transform_7(%arg0: i32) -> (i32, i32) {
    %c0_i32 = arith.constant 0 : i32
    %c0_i32_0 = arith.constant 0 : i32
    return %c0_i32, %arg0 : i32, i32
  }
}

</mosaic_0001>

<bundles_post_ra>
// kernel: tpu_custom_call.1
= control target key start
LH: loop header
LB: loop body
LE: loop exit
PB: predicated region body
PF: predicated region fallthrough
CT: control target
= control target key end

     0   :  { %v760_v2 = vmov 1   ;;  %v761_v4 = vmov 2   ;;  %s1009_s0 = inlined_call_operand.vmem [shape: f32[4,128], index: 0, kind: input, shape index: {}]   ;;  %s1010_s1 = inlined_call_operand.vmem [shape: f32[64,4], index: 1, kind: input, shape index: {}]   ;;  %s1011_s2 = inlined_call_operand.vmem [shape: f32[64,1], index: 2, kind: input, shape index: {}]   ;;  %s1012_s3 = inlined_call_operand.vmem [shape: f32[64,64], index: 3, kind: input, shape index: {}]   ;;  %s1013_s4 = inlined_call_operand.vmem [shape: f32[64,1], index: 4, kind: input, shape index: {}]   ;;  %s1014_s5 = inlined_call_operand.vmem [shape: f32[2,64], index: 5, kind: input, shape index: {}]   ;;  %s1015_s6 = inlined_call_operand.vmem [shape: f32[2,1], index: 6, kind: input, shape index: {}]   ;;  %s1016_s7 = inlined_call_operand.hbm [shape: f32[2,128], index: 7, kind: output, shape index: {}]  }
   0x1   :  { %v32_v0 = vld [vmem:[%s1010_s1 + $0x20] sm:$0xff]  ;;  %721 = vset.pattern.permute.xlu0 %v760_v2  ;;  %714 = vset.pattern.permute.xlu1 %v760_v2  ;;  %v29_v3 = vld [vmem:[%s1010_s1 + $0x8] sm:$0xff]  ;;  %v31_v5 = vld [vmem:[%s1010_s1 + $0x18] sm:$0xff] }
   0x2   :  { %v28_v1 = vld [vmem:[%s1010_s1] sm:$0xff]  ;;  %105 = vperm.xlu0 %721, %v32_v0  }
   0x3   :  { %89 = vperm.xlu1 %714, %v28_v1  }
   0x6   :  { %722 = vset.pattern.permute.xlu0 %v761_v4 }
   0x7   :  { %93 = vperm.xlu1 %714, %v29_v3   ;;  %141 = vperm.xlu0 %722, %v28_v1  }
   0x8   :  { %12 = vsyncpa [#allocation3], 0  ;;  %v30_v6 = vld [vmem:[%s1010_s1 + $0x10] sm:$0xff]  ;;  %v762_v7 = vmov 0   ;;  %v763_v8 = vmov 3   ;;  %v33_v10 = vld [vmem:[%s1010_s1 + $0x28] sm:$0xff]  ;;  %v76_v41 = vlaneseq }
   0x9   :  { %v34_v9 = vld [vmem:[%s1010_s1 + $0x30] sm:$0xff]  ;;  %v35_v11 = vld [vmem:[%s1010_s1 + $0x38] sm:$0xff]  ;;  %v249_v13 = vld [vmem:[%s1011_s2 + $0x28] sm:$0xff]  ;;  %vm364_vm0 = vcmask 523264   ;;  %vm765_vm1 = vmmov 0   ;;  %s767_s17 = smov [#allocation2]  }
   0xa   :  { %v247_v12 = vld [vmem:[%s1011_s2 + $0x18] sm:$0xff]  ;;  %v244_v14 = vld [vmem:[%s1011_s2] sm:$0xff]  ;;  %v245_v16 = vld [vmem:[%s1011_s2 + $0x8] sm:$0xff]  ;;  %v77_v43 = vshrl.u32 %v76_v41, 7  ;;  %s589_s18 = sshll.u32 %s767_s17, 4  ;;  %s590_s18 = int_to_ptr.vmem [resolvable:$true] %s589_s18 }
   0xb   :  { %715 = vset.pattern.permute.xlu1 %v761_v4  ;;  %153 = vperm.xlu0 %722, %v31_v5   ;;  %v316_v15 = vld [vmem:[%s1013_s4] sm:$0xff]  ;;  %v318_v17 = vld [vmem:[%s1013_s4 + $0x10] sm:$0xff]  ;;  %v251_v24 = vld [vmem:[%s1011_s2 + $0x38] sm:$0xff]  ;;  %s736_s19 = scalar_lea.vmem %s590_s18, 32  ;;  %p741_p1 = scmp.lt.s32.totalorder %s590_s18, %s590_s18 }
   0xc   :  { %145 = vperm.xlu1 %715, %v29_v3   ;;  %v320_v18 = vld [vmem:[%s1013_s4 + $0x20] sm:$0xff]  ;;  %v322_v19 = vld [vmem:[%s1013_s4 + $0x30] sm:$0xff]  ;;  %v317_v25 = vld [vmem:[%s1013_s4 + $0x8] sm:$0xff]  ;;  %v122_v46 = vsub.s32 1, %v77_v43  ;;  %v174_v48 = vsub.s32 2, %v77_v43  ;;  %v78_v49 = vsub.s32 0, %v77_v43  ;;  %p737_p0 = scmp.ne.s32.totalorder %s590_s18, %s736_s19  ;;  %p742_p2 = scmp.lt.s32.totalorder %s736_s19, %s736_s19 }
   0xd   :  { %v503_v20 = vld [vmem:[%s1015_s6] sm:$0x3]  ;;  %v246_v21 = vld [vmem:[%s1011_s2 + $0x10] sm:$0xff]  ;;  %v319_v26 = vld [vmem:[%s1013_s4 + $0x18] sm:$0xff]  ;;  %v226_v53 = vsub.s32 3, %v77_v43 }
   0xe   :  { %v248_v22 = vld [vmem:[%s1011_s2 + $0x20] sm:$0xff]  ;;  %v250_v23 = vld [vmem:[%s1011_s2 + $0x30] sm:$0xff]  ;;  %v321_v28 = vld [vmem:[%s1013_s4 + $0x28] sm:$0xff]  ;;  %p743_p3 = por %p742_p2, %p741_p1 }
   0xf   :  { %157 = vperm.xlu0 %722, %v32_v0   ;;  %v308_v27 = vld [vmem:[%s1012_s3] sm:$0xff]  ;;  %v323_v31 = vld [vmem:[%s1013_s4 + $0x38] sm:$0xff] }
  0x10   :  { %716 = vset.pattern.permute.xlu1 %v762_v7  ;;  %647 = vmatprep.mubr.msk.f32.mxu0 %vm364_vm0, %v308_v27  ;;  %v27_v47 = vld [vmem:[%s1009_s0] sm:$0xf]  ;;  %p744_p4 = pnand %p743_p3, %p737_p0 }
  0x11   :  { %48 = vperm.xlu1 %716, %v30_v6   ;;  %v917_v52 = vrot.slane %v27_v47, %v122_v46  ;;  %v920_v55 = vrot.slane %v27_v47, %v174_v48  ;;  %v922_v56 = vrot.slane %v27_v47, %v78_v49  ;;  %v925_v59 = vrot.slane %v27_v47, %v226_v53 }
  0x13   :  { %726 = vset.pattern.permute.xlu0 %v763_v8 }
  0x14   :  { %193 = vperm.xlu0 %726, %v28_v1  }
  0x15   :  { %717 = vset.pattern.permute.xlu1 %v760_v2 }
  0x16   :  { %97 = vperm.xlu1 %717, %v30_v6  }
  0x18   :  { %205 = vperm.xlu0 %726, %v31_v5  }
  0x1a   :  { %101 = vperm.xlu1 %717, %v31_v5  }
  0x1c   :  { %209 = vperm.xlu0 %726, %v32_v0  }
  0x1e   :  { %718 = vset.pattern.permute.xlu1 %v763_v8 }
  0x1f   :  { %197 = vperm.xlu1 %718, %v29_v3  }
  0x20   :  { %217 = vperm.xlu0 %726, %v34_v9  }
  0x23   :  { %719 = vset.pattern.permute.xlu1 %v761_v4 }
  0x24   :  { %149 = vperm.xlu1 %719, %v30_v6   ;;  %733 = vset.pattern.permute.xlu0 %v762_v7 }
  0x25   :  { %38 = vperm.xlu0 %733, %v28_v1  }
  0x28   :  { %720 = vset.pattern.permute.xlu1 %v762_v7 }
  0x29   :  { %58 = vperm.xlu1 %720, %v32_v0   ;;  %43 = vperm.xlu0 %733, %v29_v3  }
  0x2d   :  { %63 = vperm.xlu1 %720, %v33_v10   ;;  %53 = vperm.xlu0 %733, %v31_v5  }
  0x31   :  { %723 = vset.pattern.permute.xlu1 %v760_v2  ;;  %73 = vperm.xlu0 %733, %v35_v11  }
  0x32   :  { %109 = vperm.xlu1 %723, %v33_v10  }
  0x35   :  { %269 = vperm.xlu0 %733, %v247_v12  }
  0x36   :  { %724 = vset.pattern.permute.xlu1 %v763_v8 }
  0x37   :  { %201 = vperm.xlu1 %724, %v30_v6  }
  0x39   :  { %279 = vperm.xlu0 %733, %v249_v13  }
  0x3b   :  { %725 = vset.pattern.permute.xlu1 %v762_v7 }
  0x3c   :  { %254 = vperm.xlu1 %725, %v244_v14  }
  0x3d   :  { %326 = vperm.xlu0 %733, %v316_v15  }
  0x40   :  { %259 = vperm.xlu1 %725, %v245_v16  }
  0x41   :  { %336 = vperm.xlu0 %733, %v318_v17  }
  0x44   :  { %727 = vset.pattern.permute.xlu1 %v761_v4 }
  0x45   :  { %161 = vperm.xlu1 %727, %v33_v10   ;;  %346 = vperm.xlu0 %733, %v320_v18  }
  0x49   :  { %728 = vset.pattern.permute.xlu1 %v762_v7  ;;  %356 = vperm.xlu0 %733, %v322_v19  }
  0x4a   :  { %68 = vperm.xlu1 %728, %v34_v9  }
  0x4d   :  { %506 = vperm.xlu0 %733, %v503_v20  }
  0x4e   :  { %729 = vset.pattern.permute.xlu1 %v760_v2 }
  0x4f   :  { %113 = vperm.xlu1 %729, %v34_v9  }
  0x53   :  { %117 = vperm.xlu1 %729, %v35_v11  }
  0x57   :  { %730 = vset.pattern.permute.xlu1 %v763_v8 }
  0x58   :  { %213 = vperm.xlu1 %730, %v33_v10  }
  0x5c   :  { %731 = vset.pattern.permute.xlu1 %v762_v7 }
  0x5d   :  { %264 = vperm.xlu1 %731, %v246_v21  }
  0x61   :  { %732 = vset.pattern.permute.xlu1 %v761_v4 }
  0x62   :  { %165 = vperm.xlu1 %732, %v34_v9  }
  0x66   :  { %169 = vperm.xlu1 %732, %v35_v11  }
  0x6a   :  { %734 = vset.pattern.permute.xlu1 %v763_v8 }
  0x6b   :  { %221 = vperm.xlu1 %734, %v35_v11  }
  0x6f   :  { %735 = vset.pattern.permute.xlu1 %v762_v7 }
  0x70   :  { %274 = vperm.xlu1 %735, %v248_v22  }
  0x74   :  { %284 = vperm.xlu1 %735, %v250_v23  }
  0x78   :  { %289 = vperm.xlu1 %735, %v251_v24  }
  0x7c   :  { %331 = vperm.xlu1 %735, %v317_v25  }
  0x80   :  { %341 = vperm.xlu1 %735, %v319_v26  }
  0x81   :  { %v106_v30 = vpop.permute.xlu0 %105 }
  0x82   :  { %v90_v29 = vpop.permute.xlu1 %89  ;;  %v128_v54 = vmul.f32 %v917_v52, %v106_v30 }
  0x83   :  { %v124_v6 = vmul.f32 %v917_v52, %v90_v29 }
  0x84   :  { %351 = vperm.xlu1 %735, %v321_v28  }
  0x86   :  { %v94_v32 = vpop.permute.xlu1 %93  ;;  %v142_v33 = vpop.permute.xlu0 %141 }
  0x87   :  { %v125_v8 = vmul.f32 %v917_v52, %v94_v32  ;;  %v176_v9 = vmul.f32 %v920_v55, %v142_v33 }
  0x88   :  { %361 = vperm.xlu1 %735, %v323_v31  }
  0x8a   :  { %v904_v35 = vpop.permute.xlu0 %153 }
  0x8b   :  { %v146_v34 = vpop.permute.xlu1 %145  ;;  %v179_v33 = vmul.f32 %v920_v55, %v904_v35 }
  0x8c   :  { %v177_v13 = vmul.f32 %v920_v55, %v146_v34 }
  0x8e   :  { %v158_v36 = vpop.permute.xlu0 %157 }
  0x8f   :  { %v180_v58 = vmul.f32 %v920_v55, %v158_v36 }
  0x90   :  { %v906_v37 = vpop.permute.xlu1 %48 }
  0x93   :  { %v194_v38 = vpop.permute.xlu0 %193 }
  0x94   :  { %v228_v14 = vmul.f32 %v925_v59, %v194_v38 }
  0x95   :  { %v908_v39 = vpop.permute.xlu1 %97 }
  0x96   :  { %v126_v41 = vmul.f32 %v917_v52, %v908_v39 }
  0x97   :  { %v910_v40 = vpop.permute.xlu0 %205 }
  0x98   :  { %v231_v43 = vmul.f32 %v925_v59, %v910_v40 }
  0x99   :  { %v102_v42 = vpop.permute.xlu1 %101 }
  0x9a   :  { %v127_v31 = vmul.f32 %v917_v52, %v102_v42 }
  0x9b   :  { %v210_v44 = vpop.permute.xlu0 %209 }
  0x9c   :  { %v232_v62 = vmul.f32 %v925_v59, %v210_v44 }
  0x9e   :  { %v198_v45 = vpop.permute.xlu1 %197 }
  0x9f   :  { %v915_v50 = vpop.permute.xlu0 %217  ;;  %v229_v18 = vmul.f32 %v925_v59, %v198_v45  ;;  %v82_v45 = vmul.f32 %v922_v56, %v906_v37 }
  0xa1   :  { %v134_v42 = vadd.f32 %v126_v41, %v82_v45  ;;  %v766_v41 = vmov 0.0  }
  0xa2   :  { %675 = vmatprep.mubr.msk.f32.mxu1 %vm765_vm1, %v766_v41 }
  0xa3   :  { %v150_v51 = vpop.permute.xlu1 %149 }
  0xa4   :  { %v39_v60 = vpop.permute.xlu0 %38  ;;  %v178_v46 = vmul.f32 %v920_v55, %v150_v51 }
  0xa5   :  { %v80_v4 = vmul.f32 %v922_v56, %v39_v60 }
  0xa6   :  { %v186_v53 = vadd.f32 %v178_v46, %v134_v42 }
  0xa7   :  { %v132_v10 = vadd.f32 %v124_v6, %v80_v4 }
  0xa8   :  { %v59_v57 = vpop.permute.xlu1 %58  ;;  %v44_v2 = vpop.permute.xlu0 %43 }
  0xa9   :  { %v84_v61 = vmul.f32 %v922_v56, %v59_v57  ;;  %v81_v7 = vmul.f32 %v922_v56, %v44_v2  ;;  %v184_v15 = vadd.f32 %v176_v9, %v132_v10 }
  0xab   :  { %v136_v63 = vadd.f32 %v128_v54, %v84_v61  ;;  %v133_v11 = vadd.f32 %v125_v8, %v81_v7  ;;  %v236_v19 = vadd.f32 %v228_v14, %v184_v15 }
  0xac   :  { %v64_v0 = vpop.permute.xlu1 %63  ;;  %v54_v28 = vpop.permute.xlu0 %53 }
  0xad   :  { %v188_v1 = vadd.f32 %v180_v58, %v136_v63  ;;  %v185_v16 = vadd.f32 %v177_v13, %v133_v11  ;;  %v83_v30 = vmul.f32 %v922_v56, %v54_v28  ;;  %v85_v37 = vmul.f32 %v922_v56, %v64_v0 }
  0xaf   :  { %v929_v3 = vadd.f32 %v232_v62, %v188_v1  ;;  %v237_v21 = vadd.f32 %v229_v18, %v185_v16  ;;  %v135_v34 = vadd.f32 %v127_v31, %v83_v30  ;;  %v311_v31 = vld [vmem:[%s1012_s3 + $0x18] sm:$0xff] }
  0xb0   :  { %v74_v36 = vpop.permute.xlu0 %73 }
  0xb1   :  { %v110_v5 = vpop.permute.xlu1 %109  ;;  %v187_v44 = vadd.f32 %v179_v33, %v135_v34  ;;  %v313_v33 = vld [vmem:[%s1012_s3 + $0x28] sm:$0xff]  ;;  %v314_v34 = vld [vmem:[%s1012_s3 + $0x30] sm:$0xff] }
  0xb2   :  { %v129_v63 = vmul.f32 %v917_v52, %v110_v5 }
  0xb3   :  { %v239_v47 = vadd.f32 %v231_v43, %v187_v44 }
  0xb4   :  { %v270_v49 = vpop.permute.xlu0 %269  ;;  %v137_v2 = vadd.f32 %v129_v63, %v85_v37 }
  0xb5   :  { %v295_v54 = vadd.f32 %v270_v49, %v239_v47 }
  0xb6   :  { %v202_v12 = vpop.permute.xlu1 %201 }
  0xb7   :  { %v230_v48 = vmul.f32 %v925_v59, %v202_v12  ;;  %v303_v60 = vmax.f32 %v295_v54, 0.0  ;;  %v87_v12 = vmul.f32 %v922_v56, %v74_v36  ;;  %v315_v36 = vld [vmem:[%s1012_s3 + $0x38] sm:$0xff] }
  0xb8   :  { %v280_v5 = vpop.permute.xlu0 %279 }
  0xb9   :  { %v238_v57 = vadd.f32 %v230_v48, %v186_v53 }
  0xbb   :  { %v255_v17 = vpop.permute.xlu1 %254 }
  0xbc   :  { %v292_v20 = vadd.f32 %v255_v17, %v236_v19  ;;  %v234_v19 = vmul.f32 %v925_v59, %v915_v50  ;;  %v309_v50 = vld [vmem:[%s1012_s3 + $0x8] sm:$0xff]  ;;  %v327_v44 = vpop.permute.xlu0 %326 }
  0xbe   :  { %v300_v24 = vmax.f32 %v292_v20, 0.0 }
  0xbf   :  { %v260_v22 = vpop.permute.xlu1 %259 }
  0xc0   :  { %v293_v23 = vadd.f32 %v260_v22, %v237_v21  ;;  %v337_v42 = vpop.permute.xlu0 %336 }
  0xc2   :  { %v301_v25 = vmax.f32 %v293_v23, 0.0 }
  0xc4   :  { %v162_v26 = vpop.permute.xlu1 %161  ;;  %v678_v27 = vpack.c.bf16 %v301_v25, %v300_v24 }
  0xc5   :  { %v181_v51 = vmul.f32 %v920_v55, %v162_v26 }
  0xc6   :  { %679 = vmatprep.subr.bf16.mxu0 %v678_v27 }
  0xc7   :  { %681 = vmatpush3.bf16.msra.mxu0 %v678_v27  ;;  %v189_v6 = vadd.f32 %v181_v51, %v137_v2 }
  0xc9   :  { %v69_v29 = vpop.permute.xlu1 %68 }
  0xca   :  { %v86_v10 = vmul.f32 %v922_v56, %v69_v29 }
  0xce   :  { %v114_v32 = vpop.permute.xlu1 %113 }
  0xcf   :  { %v130_v7 = vmul.f32 %v917_v52, %v114_v32  ;;  %v312_v32 = vld [vmem:[%s1012_s3 + $0x20] sm:$0xff] }
  0xd1   :  { %v138_v0 = vadd.f32 %v130_v7, %v86_v10 }
  0xd2   :  { %v118_v38 = vpop.permute.xlu1 %117 }
  0xd3   :  { %v131_v13 = vmul.f32 %v917_v52, %v118_v38  ;;  %v764_v38 = vmov 0.0|0.0  }
  0xd4   :  { %694 = vmatprep.subr.bf16.mxu1 %v764_v38 }
  0xd5   :  { %v139_v20 = vadd.f32 %v131_v13, %v87_v12 }
  0xd7   :  { %v214_v35 = vpop.permute.xlu1 %213 }
  0xd8   :  { %v233_v4 = vmul.f32 %v925_v59, %v214_v35 }
  0xda   :  { %v241_v8 = vadd.f32 %v233_v4, %v189_v6 }
  0xdc   :  { %v265_v58 = vpop.permute.xlu1 %264  ;;  %v297_v14 = vadd.f32 %v280_v5, %v241_v8 }
  0xdd   :  { %v294_v39 = vadd.f32 %v265_v58, %v238_v57 }
  0xde   :  { %v305_v23 = vmax.f32 %v297_v14, 0.0 }
  0xdf   :  { %v302_v61 = vmax.f32 %v294_v39, 0.0 }
  0xe1   :  { %v682_v40 = vpack.c.bf16 %v303_v60, %v302_v61  ;;  %v166_v62 = vpop.permute.xlu1 %165 }
  0xe2   :  { %v182_v11 = vmul.f32 %v920_v55, %v166_v62 }
  0xe3   :  { %683 = vmatprep.subr.bf16.mxu0 %v682_v40 }
  0xe4   :  { %685 = vmatpush3.bf16.msra.mxu0 %v682_v40  ;;  %v190_v16 = vadd.f32 %v182_v11, %v138_v0  ;;  %v347_v40 = vpop.permute.xlu0 %346 }
  0xe5   :  { %v170_v1 = vpop.permute.xlu1 %169 }
  0xe6   :  { %v183_v17 = vmul.f32 %v920_v55, %v170_v1  ;;  %v242_v26 = vadd.f32 %v234_v19, %v190_v16  ;;  %v502_v16 = vld [vmem:[%s1014_s5] sm:$0x3] }
  0xe8   :  { %v191_v56 = vadd.f32 %v183_v17, %v139_v20  ;;  %v357_v10 = vpop.permute.xlu0 %356 }
  0xea   :  { %v222_v9 = vpop.permute.xlu1 %221 }
  0xeb   :  { %v235_v21 = vmul.f32 %v925_v59, %v222_v9  ;;  %v310_v59 = vld [vmem:[%s1012_s3 + $0x10] sm:$0xff] }
  0xec   :  { %v507_v17 = vpop.permute.xlu0 %506 }
  0xed   :  { %v243_v27 = vadd.f32 %v235_v21, %v191_v56 }
  0xef   :  { %v275_v15 = vpop.permute.xlu1 %274 }
  0xf0   :  { %v296_v18 = vadd.f32 %v275_v15, %v929_v3 }
  0xf2   :  { %v304_v22 = vmax.f32 %v296_v18, 0.0 }
  0xf3   :  { %v285_v24 = vpop.permute.xlu1 %284 }
  0xf4   :  { %v686_v25 = vpack.c.bf16 %v305_v23, %v304_v22  ;;  %v298_v52 = vadd.f32 %v285_v24, %v242_v26 }
  0xf6   :  { %687 = vmatprep.subr.bf16.mxu0 %v686_v25  ;;  %v306_v29 = vmax.f32 %v298_v52, 0.0 }
  0xf7   :  { %v290_v28 = vpop.permute.xlu1 %289  ;;  %689 = vmatpush3.bf16.msra.mxu0 %v686_v25 }
  0xf8   :  { %v299_v55 = vadd.f32 %v290_v28, %v243_v27 }
  0xfa   :  { %v307_v3 = vmax.f32 %v299_v55, 0.0 }
  0xfb   :  { %v332_v43 = vpop.permute.xlu1 %331 }
  0xfc   :  { %v690_v30 = vpack.c.bf16 %v307_v3, %v306_v29 }
  0xfe   :  { %691 = vmatprep.subr.bf16.mxu0 %v690_v30 }
  0xff   :  { %693 = vmatpush3.bf16.msra.mxu0 %v690_v30  ;;  %v342_v45 = vpop.permute.xlu1 %341 }
 0x102   :  { %648 = vmatmul.mubr.msk.f32.vlgmr.msra.gmra.mrb[0].mxu0 %vm364_vm0, %v309_v50 }
 0x103   :  { %650 = vmatprep.mubr.msk.f32.mxu0 %vm364_vm0, %v310_v59  ;;  %v352_v39 = vpop.permute.xlu1 %351 }
 0x106   :  { %651 = vmatmul.mubr.msk.f32.gmra.mrb[2].mxu0 %vm364_vm0, %v311_v31 }
 0x107   :  { %653 = vmatprep.mubr.msk.f32.mxu0 %vm364_vm0, %v312_v32  ;;  %v362_v7 = vpop.permute.xlu1 %361 }
 0x10a   :  { %654 = vmatmul.mubr.msk.f32.gmra.mrb[4].mxu0 %vm364_vm0, %v313_v33 }
 0x10b   :  { %656 = vmatprep.mubr.msk.f32.mxu0 %vm364_vm0, %v314_v34 }
 0x10e   :  { %657 = vmatmul.mubr.msk.f32.gmra.mrb[6].mxu0 %vm364_vm0, %v315_v36 }
 0x1d5   :  { %v649_v46 = vpop.f32.mrb[0].mxu0 }
 0x1d6   :  { %v461_v47 = vadd.f32 %v649_v46, %v332_v43  ;;  %v455_v48 = vpop.f32.mrb[1].mxu0 }
 0x1d7   :  { %v456_v35 = vadd.f32 %v455_v48, %v327_v44 }
 0x1d8   :  { %v495_v49 = vmax.f32 %v461_v47, 0.0 }
 0x1d9   :  { %v494_v53 = vmax.f32 %v456_v35, 0.0  ;;  %v652_v54 = vpop.f32.mrb[2].mxu0 }
 0x1da   :  { %v471_v57 = vadd.f32 %v652_v54, %v342_v45  ;;  %v465_v58 = vpop.f32.mrb[3].mxu0 }
 0x1db   :  { %v466_v60 = vadd.f32 %v465_v58, %v337_v42  ;;  %v695_v61 = vpack.c.bf16 %v495_v49, %v494_v53 }
 0x1dc   :  { %v497_v62 = vmax.f32 %v471_v57, 0.0 }
 0x1dd   :  { %v496_v63 = vmax.f32 %v466_v60, 0.0  ;;  %v655_v37 = vpop.f32.mrb[4].mxu0  ;;  %696 = vmatpush3.bf16.msra.mxu1 %v695_v61 }
 0x1de   :  { %v481_v51 = vadd.f32 %v655_v37, %v352_v39  ;;  %v475_v1 = vpop.f32.mrb[5].mxu0  ;;  %697 = vmatprep.subr.bf16.mxu1 %v764_v38 }
 0x1df   :  { %v698_v2 = vpack.c.bf16 %v497_v62, %v496_v63  ;;  %v476_v4 = vadd.f32 %v475_v1, %v347_v40 }
 0x1e0   :  { %v499_v6 = vmax.f32 %v481_v51, 0.0 }
 0x1e1   :  { %v498_v8 = vmax.f32 %v476_v4, 0.0  ;;  %v658_v9 = vpop.f32.mrb[6].mxu0  ;;  %699 = vmatpush3.bf16.msra.mxu1 %v698_v2 }
 0x1e2   :  { %v491_v11 = vadd.f32 %v658_v9, %v362_v7  ;;  %v485_v5 = vpop.f32.mrb[7].mxu0  ;;  %700 = vmatprep.subr.bf16.mxu1 %v764_v38 }
 0x1e3   :  { %v701_v12 = vpack.c.bf16 %v499_v6, %v498_v8  ;;  %v486_v0 = vadd.f32 %v485_v5, %v357_v10 }
 0x1e4   :  { %v501_v13 = vmax.f32 %v491_v11, 0.0 }
 0x1e5   :  { %v500_v14 = vmax.f32 %v486_v0, 0.0  ;;  %702 = vmatpush3.bf16.msra.mxu1 %v701_v12 }
 0x1e6   :  { %703 = vmatprep.subr.bf16.mxu1 %v764_v38 }
 0x1e7   :  { %v704_v15 = vpack.c.bf16 %v501_v13, %v500_v14 }
 0x1e9   :  { %705 = vmatpush3.bf16.msra.mxu1 %v704_v15 }
 0x1ec   :  { %676 = vmatmul.mubr.msk.f32.vlgmr.msra.gmra.mrb[0].mxu1 %vm364_vm0, %v502_v16 }
 0x2bf   :  { %v578_v18 = vpop.f32.mrb[0].mxu1 }
 0x2c0   :  { %v579_v19 = vadd.f32 %v578_v18, %v507_v17  ;;  %v677_v20 = vpop.f32.mrb[1].mxu1 }
 0x2c2   :  { %582 = vst [vmem:[#allocation2] sm:$0x3] %v579_v19 }
 0x2c3   :  { %747 = shalt.err (!%p744_p4)
}
 0x2c4   :  { %s748_s5 = scalar_lea.hbm %s1016_s7, 32 }
 0x2c5   :  { %p749_p5 = scmp.ne.s32.totalorder %s1016_s7, %s748_s5  ;;  %p752_p6 = scmp.lt.u32.totalorder %s748_s5, %s1016_s7 }
 0x2c7   :  { %p754_p7 = pnand %p752_p6, %p749_p5 }
 0x2c9   :  { %757 = shalt.err (!%p754_p7)
}
 0x2ca   :  { %592 = dma.vmem_to_hbm [thread:$0]  %s590_s18, 32, %s1016_s7, [#allocation3]  }
 0x2cb   :  { %758 = dma.done.wait [#allocation3], 32  }
 0x2cc   :  { %759 = vsyncadd [#allocation3], 4294967264 }
 0x2cd   :  { %596 = vsyncpa [#allocation3], 1 }

</bundles_post_ra>
